<compile_context>
chip_gen: v7x
topology: tpu7x:2x2x1
jax: 0.10.0
libtpu: 0.0.40
codegen_flags: <defaults>
</compile_context>

<pallas_src>
import functools

import jax
import jax.numpy as jnp
from jax.experimental import pallas as pl
from jax.experimental.pallas import tpu as pltpu


def _round_up(x, m):
    return (x + m - 1) // m * m


def _pick_tile(n, candidates):
    for c in candidates:
        if n % c == 0:
            return c
    return n


def _pad2d(w, rows, cols, dtype=jnp.float32):
    out = jnp.zeros((rows, cols), dtype)
    return out.at[: w.shape[0], : w.shape[1]].set(w.astype(dtype))


# ---------------------------------------------------------------------------
# Kernel 1: fused projection   [XW_l | XW_r] = X @ [W_l | W_r]  (single matmul)
#   outputs: XW_l (bf16, MXU input for aggregation) and XW_r + b (f32 root branch)
# ---------------------------------------------------------------------------
def _project_kernel(x_ref, w_ref, b_ref, xwl_ref, xwr_ref, *, c_out):
    res = jnp.dot(x_ref[...], w_ref[...], preferred_element_type=jnp.float32)
    xwl_ref[...] = res[:, :c_out].astype(xwl_ref.dtype)
    xwr_ref[...] = (res[:, c_out:] + b_ref[...]).astype(xwr_ref.dtype)


def _project(x_bf16, w_cat_bf16, b_f32):
    n, c_in = x_bf16.shape
    c_out = w_cat_bf16.shape[1] // 2
    tm = _pick_tile(n, (512, 256, 128))
    kernel = functools.partial(_project_kernel, c_out=c_out)
    return pl.pallas_call(
        kernel,
        out_shape=(
            jax.ShapeDtypeStruct((n, c_out), jnp.bfloat16),  # XW_l
            jax.ShapeDtypeStruct((n, c_out), jnp.float32),   # XW_r + b
        ),
        grid=(n // tm,),
        in_specs=[
            pl.BlockSpec((tm, c_in), lambda i: (i, 0)),
            pl.BlockSpec((c_in, 2 * c_out), lambda i: (0, 0)),
            pl.BlockSpec((1, c_out), lambda i: (0, 0)),
        ],
        out_specs=(
            pl.BlockSpec((tm, c_out), lambda i: (i, 0)),
            pl.BlockSpec((tm, c_out), lambda i: (i, 0)),
        ),
        compiler_params=pltpu.CompilerParams(dimension_semantics=("parallel",)),
    )(x_bf16, w_cat_bf16, b_f32)


# ---------------------------------------------------------------------------
# Kernel 2: tiled mean-aggregation + root branch + (optional) fused ReLU
#   grid = (N/tm, N/tk);  acc[tm,Cout] += A_counts[tm,tk] @ XW_l[tk,Cout]
#   epilogue:  out = acc * inv_deg + XW_r  (exact f32 mean normalization)
# ---------------------------------------------------------------------------
def _aggregate_kernel(a_ref, xwl_ref, xwr_ref, invdeg_ref, o_ref, acc_ref,
                      *, apply_relu, resident_xwl, tk):
    k = pl.program_id(1)

    @pl.when(k == 0)
    def _():
        acc_ref[...] = jnp.zeros_like(acc_ref)

    a = a_ref[...].astype(jnp.bfloat16)  # int8 counts -> bf16 (exact small ints)
    if resident_xwl:
        off = pl.multiple_of(k * tk, tk)
        xwl = xwl_ref[pl.ds(off, tk), :]
    else:
        xwl = xwl_ref[...]
    acc_ref[...] += jnp.dot(a, xwl, preferred_element_type=jnp.float32)

    @pl.when(k == pl.num_programs(1) - 1)
    def _():
        out = acc_ref[...] * invdeg_ref[...] + xwr_ref[...]
        if apply_relu:
            out = jnp.maximum(out, 0.0)
        o_ref[...] = out.astype(o_ref.dtype)


def _aggregate(a_i8, xwl_bf16, xwr_f32, inv_deg, *, apply_relu, out_dtype):
    n = a_i8.shape[0]
    c_out = xwl_bf16.shape[1]
    tk = min(2048, n)                       # n is padded to a multiple of tk
    tm = _pick_tile(n, (512, 256, 128))

    # Keep XW_l fully VMEM-resident (one DMA for the whole kernel) when small.
    resident = (n * c_out * 2) <= (8 << 20)
    if resident:
        xwl_spec = pl.BlockSpec((n, c_out), lambda i, k: (0, 0))
        xwl_blk_bytes = n * c_out * 2
    else:
        xwl_spec = pl.BlockSpec((tk, c_out), lambda i, k: (k, 0))
        xwl_blk_bytes = tk * c_out * 2

    out_bytes = 2 if out_dtype == jnp.bfloat16 else 4
    est = (2 * tm * tk                      # int8 A tile, double-buffered
           + 2 * xwl_blk_bytes              # XW_l
           + 2 * tm * c_out * 4             # XW_r + b
           + 2 * tm * 4                     # inv_deg
           + 2 * tm * c_out * out_bytes     # output
           + tm * c_out * 4)                # f32 accumulator scratch
    vmem_limit = int(min(max(est * 3 // 2 + (2 << 20), 32 << 20), 48 << 20))

    kernel = functools.partial(
        _aggregate_kernel, apply_relu=apply_relu, resident_xwl=resident, tk=tk
    )
    return pl.pallas_call(
        kernel,
        out_shape=jax.ShapeDtypeStruct((n, c_out), out_dtype),
        grid=(n // tm, n // tk),
        in_specs=[
            pl.BlockSpec((tm, tk), lambda i, k: (i, k)),      # A counts (int8)
            xwl_spec,                                         # XW_l (bf16)
            pl.BlockSpec((tm, c_out), lambda i, k: (i, 0)),   # XW_r + b (f32)
            pl.BlockSpec((tm, 1), lambda i, k: (i, 0)),       # 1/deg (f32)
        ],
        out_specs=pl.BlockSpec((tm, c_out), lambda i, k: (i, 0)),
        scratch_shapes=[pltpu.VMEM((tm, c_out), jnp.float32)],
        compiler_params=pltpu.CompilerParams(
            dimension_semantics=("parallel", "arbitrary"),
            vmem_limit_bytes=vmem_limit,
        ),
    )(a_i8, xwl_bf16, xwr_f32, inv_deg)


def sage_conv(a_i8, inv_deg, x_bf16, w_cat_bf16, b_f32, *, apply_relu, out_dtype):
    """One SAGEConv layer: fused projection, then tiled mean-aggregation."""
    xwl, xwr = _project(x_bf16, w_cat_bf16, b_f32)
    return _aggregate(a_i8, xwl, xwr, inv_deg, apply_relu=apply_relu,
                      out_dtype=out_dtype)


# ---------------------------------------------------------------------------
# Graph prep: un-normalized int8 edge counts at padded size + f32 1/deg
# ---------------------------------------------------------------------------
# TODO(synk): for real sparse graphs, replace the dense N x N adjacency with a
# CSR / scalar-prefetch gather formulation (PrefetchScalarGridSpec + DMA).
def build_graph_operands(edge_index, n_p):
    src, dst = edge_index[0], edge_index[1]
    # One-shot scatter into the padded int8 target (no f32 N^2 intermediate).
    # TODO(synk): >127 duplicate edges between the same (dst,src) pair would
    # overflow int8; fine for typical graphs.
    a_i8 = jnp.zeros((n_p, n_p), jnp.int8).at[dst, src].add(jnp.int8(1))
    deg = jnp.zeros((n_p, 1), jnp.float32).at[dst, 0].add(1.0)   # O(E), not O(N^2)
    inv_deg = 1.0 / jnp.maximum(deg, 1.0)  # 0-in-degree rows aggregate to 0
    return a_i8, inv_deg


# ---------------------------------------------------------------------------
# Parameters (deterministic, uniform +-1/sqrt(fan_in), bias = 0)
# ---------------------------------------------------------------------------
def init_sage_params(key, c_in, c_out):
    k1, k2 = jax.random.split(key)
    scale = 1.0 / float(jnp.sqrt(jnp.asarray(c_in, jnp.float32)))
    w_l = jax.random.uniform(k1, (c_in, c_out), jnp.float32, -scale, scale)
    w_r = jax.random.uniform(k2, (c_in, c_out), jnp.float32, -scale, scale)
    b = jnp.zeros((1, c_out), jnp.float32)
    return w_l, w_r, b


def init_graphsage_params(key, in_channels, hidden_channels, out_channels):
    k1, k2 = jax.random.split(key)
    return (
        init_sage_params(k1, in_channels, hidden_channels),
        init_sage_params(k2, hidden_channels, out_channels),
    )


def _pack_layer(w_l, w_r, b, c_in_p, c_out_p):
    w_cat = jnp.concatenate(
        [_pad2d(w_l, c_in_p, c_out_p), _pad2d(w_r, c_in_p, c_out_p)], axis=1
    ).astype(jnp.bfloat16)
    b_p = _pad2d(b, 1, c_out_p, jnp.float32)
    return w_cat, b_p


# ---------------------------------------------------------------------------
# GraphSAGE forward:  relu(conv1) -> dropout -> conv2
# ---------------------------------------------------------------------------
def graphsage_forward(params, x, edge_index):
    (w_l1, w_r1, b1), (w_l2, w_r2, b2) = params
    n, c_in = x.shape
    hidden = w_l1.shape[1]
    c_out = w_l2.shape[1]

    # Pad node count so the aggregation k-tile always divides it exactly.
    n_p = _round_up(n, 128)
    tk = min(2048, n_p)
    n_p = _round_up(n_p, tk)
    c_in_p = _round_up(c_in, 128)
    hid_p = _round_up(hidden, 128)
    c_out_p = _round_up(c_out, 128)

    a_i8, inv_deg = build_graph_operands(edge_index, n_p)

    x_p = _pad2d(x, n_p, c_in_p, jnp.bfloat16)
    w1, b1p = _pack_layer(w_l1, w_r1, b1, c_in_p, hid_p)
    w2, b2p = _pack_layer(w_l2, w_r2, b2, hid_p, c_out_p)

    # Layer 1: ReLU fused; hidden activation kept bf16 (halves h HBM traffic).
    h = sage_conv(a_i8, inv_deg, x_p, w1, b1p, apply_relu=True,
                  out_dtype=jnp.bfloat16)
    # TODO(synk): F.dropout(p=0.3) is identity in eval mode; training-mode RNG
    # dropout (pltpu.prng_*) is not implemented here.
    out = sage_conv(a_i8, inv_deg, h, w2, b2p, apply_relu=False,
                    out_dtype=jnp.float32)
    return out[:n, :c_out]


if __name__ == "__main__":
    key = jax.random.PRNGKey(0)
    k_x, k_e, k_p = jax.random.split(key, 3)

    num_nodes = 64
    in_channels, hidden_channels, out_channels = 16, 32, 8
    num_edges = 256

    x = jax.random.normal(k_x, (num_nodes, in_channels), jnp.float32)
    edge_index = jax.random.randint(k_e, (2, num_edges), 0, num_nodes, jnp.int32)

    params = init_graphsage_params(k_p, in_channels, hidden_channels, out_channels)

    out = graphsage_forward(params, x, edge_index)
    out = jax.block_until_ready(out)
    assert out.shape == (num_nodes, out_channels)
    print("KERNEL_OK")
</pallas_src>

<mosaic_0001>
module attributes {stable_mosaic.version = 11 : i64} {
  func.func @_project_kernel(%arg0: i32, %arg1: memref<128x128xbf16, #tpu.memory_space<vmem>>, %arg2: memref<128x256xbf16, #tpu.memory_space<vmem>>, %arg3: memref<1x128xf32, #tpu.memory_space<vmem>>, %arg4: memref<128x128xbf16, #tpu.memory_space<vmem>>, %arg5: memref<128x128xf32, #tpu.memory_space<vmem>>) attributes {dimension_semantics = [#tpu.dimension_semantics<parallel>], iteration_bounds = array<i64: 1>, scalar_prefetch = 0 : i64, scratch_operands = 0 : i64, tpu.core_type = #tpu.core_type<tc>, window_params = [{transform_indices = @transform_0, window_bounds = array<i64: 128, 128>}, {pipeline_mode = #tpu.pipeline_mode<synchronous>, transform_indices = @transform_1, window_bounds = array<i64: 128, 256>}, {pipeline_mode = #tpu.pipeline_mode<synchronous>, transform_indices = @transform_2, window_bounds = array<i64: 1, 128>}, {transform_indices = @transform_3, window_bounds = array<i64: 128, 128>}, {transform_indices = @transform_4, window_bounds = array<i64: 128, 128>}]} {
    %c0 = arith.constant 0 : index
    %c0_0 = arith.constant 0 : index
    %0 = vector.load %arg1[%c0, %c0_0] : memref<128x128xbf16, #tpu.memory_space<vmem>>, vector<128x128xbf16>
    %c0_1 = arith.constant 0 : index
    %c0_2 = arith.constant 0 : index
    %1 = vector.load %arg2[%c0_1, %c0_2] : memref<128x256xbf16, #tpu.memory_space<vmem>>, vector<128x256xbf16>
    %cst = arith.constant dense<0.000000e+00> : vector<128x256xf32>
    %2 = tpu.matmul %0, %1, %cst {dimension_numbers = #tpu.dot_dimension_numbers<[1], [0], [0], [1], [0, 0, 1, 1], [], []>} : vector<128x128xbf16>, vector<128x256xbf16>, vector<128x256xf32> -> vector<128x256xf32>
    %3 = vector.extract_strided_slice %2 {offsets = [0, 0], sizes = [128, 128], strides = [1, 1]} : vector<128x256xf32> to vector<128x128xf32>
    %4 = arith.truncf %3 : vector<128x128xf32> to vector<128x128xbf16>
    %c0_3 = arith.constant 0 : index
    %c0_4 = arith.constant 0 : index
    %5 = vector.load %arg4[%c0_3, %c0_4] : memref<128x128xbf16, #tpu.memory_space<vmem>>, vector<128x128xbf16>
    tpu.vector_store %arg4[%c0_3, %c0_4], %4 {strides = array<i32>} : memref<128x128xbf16, #tpu.memory_space<vmem>>, vector<128x128xbf16>,
    %6 = vector.extract_strided_slice %2 {offsets = [0, 128], sizes = [128, 128], strides = [1, 1]} : vector<128x256xf32> to vector<128x128xf32>
    %c0_5 = arith.constant 0 : index
    %c0_6 = arith.constant 0 : index
    %7 = vector.load %arg3[%c0_5, %c0_6] : memref<1x128xf32, #tpu.memory_space<vmem>>, vector<1x128xf32>
    %8 = vector.broadcast %7 : vector<1x128xf32> to vector<128x128xf32>
    %9 = arith.addf %6, %8 : vector<128x128xf32>
    %c0_7 = arith.constant 0 : index
    %c0_8 = arith.constant 0 : index
    %10 = vector.load %arg5[%c0_7, %c0_8] : memref<128x128xf32, #tpu.memory_space<vmem>>, vector<128x128xf32>
    tpu.vector_store %arg5[%c0_7, %c0_8], %9 {strides = array<i32>} : memref<128x128xf32, #tpu.memory_space<vmem>>, vector<128x128xf32>,
    return
  }
  func.func @transform_0(%arg0: i32) -> (i32, i32) {
    %c0_i32 = arith.constant 0 : i32
    %c0_i32_0 = arith.constant 0 : i32
    return %arg0, %c0_i32 : i32, i32
  }
  func.func @transform_1(%arg0: i32) -> (i32, i32) {
    %c0_i32 = arith.constant 0 : i32
    %c0_i32_0 = arith.constant 0 : i32
    %c0_i32_1 = arith.constant 0 : i32
    return %c0_i32, %c0_i32_0 : i32, i32
  }
  func.func @transform_2(%arg0: i32) -> (i32, i32) {
    %c0_i32 = arith.constant 0 : i32
    %c0_i32_0 = arith.constant 0 : i32
    %c0_i32_1 = arith.constant 0 : i32
    return %c0_i32, %c0_i32_0 : i32, i32
  }
  func.func @transform_3(%arg0: i32) -> (i32, i32) {
    %c0_i32 = arith.constant 0 : i32
    %c0_i32_0 = arith.constant 0 : i32
    return %arg0, %c0_i32 : i32, i32
  }
  func.func @transform_4(%arg0: i32) -> (i32, i32) {
    %c0_i32 = arith.constant 0 : i32
    %c0_i32_0 = arith.constant 0 : i32
    return %arg0, %c0_i32 : i32, i32
  }
}

</mosaic_0001>

<bundles_post_ra>
// kernel: tpu_custom_call.1
= control target key start
LH: loop header
LB: loop body
LE: loop exit
PB: predicated region body
PF: predicated region fallthrough
CT: control target
= control target key end

     0   :  { %10 = vsyncpa [#allocation3], 0  ;;  %s860_s0 = inlined_call_operand.hbm [shape: bf16[128,128], index: 0, kind: input, shape index: {}]   ;;  %s861_s1 = inlined_call_operand.hbm [shape: bf16[128,256], index: 1, kind: input, shape index: {}]   ;;  %s862_s2 = inlined_call_operand.vmem [shape: f32[1,128], index: 2, kind: input, shape index: {}]   ;;  %s863_s3 = inlined_call_operand.hbm [shape: bf16[128,128], index: 3, kind: output, shape index: {0}]   ;;  %s864_s4 = inlined_call_operand.hbm [shape: f32[128,128], index: 4, kind: output, shape index: {1}]  }
   0x1   :  { %11 = vsyncpa [#allocation6], 0 }
   0x2   :  { %12 = vsyncpa [#allocation4], 0 }
   0x3   :  { %13 = vsyncpa [#allocation9], 0  ;;  %s730_s15 = smov [#allocation2]   ;;  %s634_s19 = scalar_lea.hbm %s860_s0, 1024 }
   0x4   :  { %s19_s16 = sshll.u32 %s730_s15, 4  ;;  %p635_p0 = scmp.ne.s32.totalorder %s860_s0, %s634_s19  ;;  %s20_s16 = int_to_ptr.vmem [resolvable:$true] %s19_s16 }
   0x5   :  { %p638_p1 = scmp.lt.u32.totalorder %s634_s19, %s860_s0 }
   0x7   :  { %p640_p2 = pnand %p638_p1, %p635_p0 }
   0x9   :  { %643 = shalt.err (!%p640_p2)
}
   0xa   :  { %s644_s24 = scalar_lea.vmem %s20_s16, 1024  ;;  %p649_p4 = scmp.lt.s32.totalorder %s20_s16, %s20_s16 }
   0xb   :  { %p645_p3 = scmp.ne.s32.totalorder %s20_s16, %s644_s24  ;;  %p650_p5 = scmp.lt.s32.totalorder %s644_s24, %s644_s24 }
   0xd   :  { %p651_p6 = por %p650_p5, %p649_p4 }
   0xf   :  { %p652_p7 = pnand %p651_p6, %p645_p3 }
  0x11   :  { %655 = shalt.err (!%p652_p7)
}
  0x12   :  { %s731_s25 = smov 64   ;;  %s732_s26 = smov 4  }
  0x13   :  { %25 = dma.hbm_to_vmem [thread:$0]  %s860_s0, 1024, %s20_s16, [#allocation3], %s731_s25, %s731_s25, %s732_s26  }
  0x14   :  { %s733_s29 = smov [#allocation5]   ;;  %s656_s7 = scalar_lea.hbm %s861_s1, 2048 }
  0x15   :  { %s31_s30 = sshll.u32 %s733_s29, 4  ;;  %p657_p8 = scmp.ne.s32.totalorder %s861_s1, %s656_s7  ;;  %s32_s30 = int_to_ptr.vmem [resolvable:$true] %s31_s30 }
  0x16   :  { %p660_p9 = scmp.lt.u32.totalorder %s656_s7, %s861_s1 }
  0x18   :  { %p662_p10 = pnand %p660_p9, %p657_p8 }
  0x1a   :  { %665 = shalt.err (!%p662_p10)
}
  0x1b   :  { %s666_s12 = scalar_lea.vmem %s32_s30, 2048  ;;  %p671_p12 = scmp.lt.s32.totalorder %s32_s30, %s32_s30 }
  0x1c   :  { %p667_p11 = scmp.ne.s32.totalorder %s32_s30, %s666_s12  ;;  %p672_p13 = scmp.lt.s32.totalorder %s666_s12, %s666_s12 }
  0x1e   :  { %p673_p0 = por %p672_p13, %p671_p12 }
  0x20   :  { %p674_p1 = pnand %p673_p0, %p667_p11 }
  0x22   :  { %677 = shalt.err (!%p674_p1)
}
  0x23   :  { %s734_s0 = smov 128   ;;  %s735_s13 = smov 8  }
  0x24   :  { %37 = dma.hbm_to_vmem [thread:$0]  %s861_s1, 2048, %s32_s30, [#allocation6], %s734_s0, %s734_s0, %s735_s13  }
  0x25   :  { %722 = dma.done.wait [#allocation3], 1024  }
  0x26   :  { %723 = vsyncadd [#allocation3], 4294966272 }
  0x27   :  { %724 = dma.done.wait [#allocation6], 2048  }
  0x28   :  { %725 = vsyncadd [#allocation6], 4294965248  ;;  %v736_v0 = vmov 0   ;;  %v602_v1 = vld [vmem:[#allocation5 + $0x4] ss:$8 sps:$4 sm:$0xff]   ;;  %v630_v21 = vld [vmem:[#allocation2 + $0x10] sm:$0xff]  }
  0x29   :  { %239 = vmatprep.mubr.bf16.mxu0 %v736_v0  ;;  %279 = vmatprep.mubr.bf16.mxu1 %v736_v0  ;;  %v604_v2 = vld [vmem:[#allocation5] ss:$8 sps:$4 sm:$0xff]   ;;  %v605_v3 = vld [vmem:[#allocation5 + $0x14] ss:$8 sps:$4 sm:$0xff]   ;;  %v607_v4 = vld [vmem:[#allocation5 + $0x10] ss:$8 sps:$4 sm:$0xff]  }
  0x2a   :  { %207 = vmatprep.subr.bf16.mxu0 %v602_v1  ;;  %577 = vmatprep.subr.bf16.mxu1 %v602_v1  ;;  %v608_v5 = vld [vmem:[#allocation5 + $0x24] ss:$8 sps:$4 sm:$0xff]   ;;  %v610_v6 = vld [vmem:[#allocation5 + $0x20] ss:$8 sps:$4 sm:$0xff]   ;;  %v611_v7 = vld [vmem:[#allocation5 + $0x34] ss:$8 sps:$4 sm:$0xff]  }
  0x2b   :  { %208 = vmatpush1.bf16.msra.mxu0 %v604_v2  ;;  %585 = vmatpush1.bf16.msra.mxu1 %v604_v2  ;;  %v613_v8 = vld [vmem:[#allocation5 + $0x30] ss:$8 sps:$4 sm:$0xff]   ;;  %v614_v9 = vld [vmem:[#allocation5 + $0x44] ss:$8 sps:$4 sm:$0xff]   ;;  %v616_v10 = vld [vmem:[#allocation5 + $0x40] ss:$8 sps:$4 sm:$0xff]  }
  0x2c   :  { %209 = vmatprep.subr.bf16.mxu0 %v605_v3  ;;  %578 = vmatprep.subr.bf16.mxu1 %v605_v3  ;;  %v617_v11 = vld [vmem:[#allocation5 + $0x54] ss:$8 sps:$4 sm:$0xff]   ;;  %v619_v12 = vld [vmem:[#allocation5 + $0x50] ss:$8 sps:$4 sm:$0xff]   ;;  %v620_v13 = vld [vmem:[#allocation5 + $0x64] ss:$8 sps:$4 sm:$0xff]  }
  0x2d   :  { %v622_v14 = vld [vmem:[#allocation5 + $0x60] ss:$8 sps:$4 sm:$0xff]   ;;  %v623_v15 = vld [vmem:[#allocation5 + $0x74] ss:$8 sps:$4 sm:$0xff]   ;;  %v625_v16 = vld [vmem:[#allocation5 + $0x70] ss:$8 sps:$4 sm:$0xff]  }
  0x2e   :  { %v626_v17 = vld [vmem:[#allocation2] sm:$0xff]   ;;  %v628_v19 = vld [vmem:[#allocation2 + $0x8] sm:$0xff]   ;;  %v631_v22 = vld [vmem:[#allocation2 + $0x30] sm:$0xff]   ;;  %s738_s18 = smov [#allocation8]  }
  0x2f   :  { %210 = vmatpush1.bf16.msra.mxu0 %v607_v4  ;;  %586 = vmatpush1.bf16.msra.mxu1 %v607_v4  ;;  %v627_v18 = vld [vmem:[#allocation2 + $0x20] sm:$0xff]   ;;  %v629_v20 = vld [vmem:[#allocation2 + $0x28] sm:$0xff]   ;;  %v632_v23 = vld [vmem:[#allocation2 + $0x18] sm:$0xff]   ;;  %s456_s19 = sshll.u32 %s738_s18, 4  ;;  %s823_s19 = int_to_ptr.vmem [resolvable:$true] %s456_s19 }
  0x30   :  { %211 = vmatprep.subr.bf16.mxu0 %v608_v5  ;;  %579 = vmatprep.subr.bf16.mxu1 %v608_v5  ;;  %v633_v24 = vld [vmem:[#allocation2 + $0x38] sm:$0xff]   ;;  %v805_v25 = vld [vmem:[%s862_s2] ss:$0 sm:$0xff]  ;;  %s737_s2 = smov [#allocation7]  }
  0x31   :  { %s444_s17 = sshll.u32 %s737_s2, 4  ;;  %s445_s17 = int_to_ptr.vmem [resolvable:$true] %s444_s17 }
  0x32   :  { %s678_s20 = scalar_lea.vmem %s445_s17, 1024  ;;  %p683_p3 = scmp.lt.s32.totalorder %s445_s17, %s445_s17 }
  0x33   :  { %212 = vmatpush1.bf16.msra.mxu0 %v610_v6  ;;  %587 = vmatpush1.bf16.msra.mxu1 %v610_v6  ;;  %p679_p2 = scmp.ne.s32.totalorder %s445_s17, %s678_s20  ;;  %p684_p4 = scmp.lt.s32.totalorder %s678_s20, %s678_s20 }
  0x34   :  { %213 = vmatprep.subr.bf16.mxu0 %v611_v7  ;;  %580 = vmatprep.subr.bf16.mxu1 %v611_v7 }
  0x35   :  { %p685_p5 = por %p684_p4, %p683_p3 }
  0x37   :  { %214 = vmatpush1.bf16.msra.mxu0 %v613_v8  ;;  %588 = vmatpush1.bf16.msra.mxu1 %v613_v8  ;;  %p686_p6 = pnand %p685_p5, %p679_p2 }
  0x38   :  { %215 = vmatprep.subr.bf16.mxu0 %v614_v9  ;;  %581 = vmatprep.subr.bf16.mxu1 %v614_v9 }
  0x3b   :  { %216 = vmatpush1.bf16.msra.mxu0 %v616_v10  ;;  %589 = vmatpush1.bf16.msra.mxu1 %v616_v10 }
  0x3c   :  { %217 = vmatprep.subr.bf16.mxu0 %v617_v11  ;;  %582 = vmatprep.subr.bf16.mxu1 %v617_v11 }
  0x3f   :  { %218 = vmatpush1.bf16.msra.mxu0 %v619_v12  ;;  %590 = vmatpush1.bf16.msra.mxu1 %v619_v12 }
  0x40   :  { %219 = vmatprep.subr.bf16.mxu0 %v620_v13  ;;  %583 = vmatprep.subr.bf16.mxu1 %v620_v13 }
  0x43   :  { %220 = vmatpush1.bf16.msra.mxu0 %v622_v14  ;;  %591 = vmatpush1.bf16.msra.mxu1 %v622_v14 }
  0x44   :  { %221 = vmatprep.subr.bf16.mxu0 %v623_v15  ;;  %584 = vmatprep.subr.bf16.mxu1 %v623_v15 }
  0x47   :  { %222 = vmatpush1.bf16.msra.mxu0 %v625_v16  ;;  %592 = vmatpush1.bf16.msra.mxu1 %v625_v16 }
  0x4a   :  { %240 = vmatmul.mubr.bf16.vlgmr.msra.gmra.mrb[0].mxu0 %v626_v17  ;;  %280 = vmatmul.mubr.bf16.vlgmr.msra.gmra.mrb[0].mxu1 %v627_v18 }
  0x4b   :  { %249 = vmatprep.mubr.bf16.mxu0 %v736_v0  ;;  %289 = vmatprep.mubr.bf16.mxu1 %v736_v0 }
  0x52   :  { %250 = vmatmul.mubr.bf16.gmra.mrb[4].mxu0 %v628_v19  ;;  %290 = vmatmul.mubr.bf16.gmra.mrb[4].mxu1 %v629_v20 }
  0x53   :  { %259 = vmatprep.mubr.bf16.mxu0 %v736_v0  ;;  %299 = vmatprep.mubr.bf16.mxu1 %v736_v0 }
  0x5a   :  { %260 = vmatmul.mubr.bf16.gmra.mrb[8].mxu0 %v630_v21  ;;  %300 = vmatmul.mubr.bf16.gmra.mrb[8].mxu1 %v631_v22 }
  0x5b   :  { %269 = vmatprep.mubr.bf16.mxu0 %v736_v0  ;;  %309 = vmatprep.mubr.bf16.mxu1 %v736_v0 }
  0x62   :  { %270 = vmatmul.mubr.bf16.gmra.mrb[12].mxu0 %v632_v23  ;;  %310 = vmatmul.mubr.bf16.gmra.mrb[12].mxu1 %v633_v24 }
 0x11d   :  { %v241_v26 = vpop.f32.mrb[0].mxu0  ;;  %v281_v27 = vpop.f32.mrb[0].mxu1 }
 0x11e   :  { %v243_v28 = vpop.f32.mrb[1].mxu0  ;;  %v283_v29 = vpop.f32.mrb[1].mxu1 }
 0x11f   :  { %v407_v30 = vadd.f32 %v805_v25, %v243_v28  ;;  %v415_v31 = vadd.f32 %v805_v25, %v283_v29  ;;  %v245_v32 = vpop.f32.mrb[2].mxu0  ;;  %v285_v33 = vpop.f32.mrb[2].mxu1 }
 0x120   :  { %v533_v34 = vpack.c.bf16 %v245_v32, %v241_v26  ;;  %v553_v35 = vpack.c.bf16 %v285_v33, %v281_v27  ;;  %v247_v36 = vpop.f32.mrb[3].mxu0  ;;  %v287_v37 = vpop.f32.mrb[3].mxu1 }
 0x121   :  { %423 = vst [vmem:[#allocation8] sm:$0xff] %v407_v30  ;;  %431 = vst [vmem:[#allocation8 + $0x40] sm:$0xff] %v415_v31  ;;  %v408_v38 = vadd.f32 %v805_v25, %v247_v36  ;;  %v416_v39 = vadd.f32 %v805_v25, %v287_v37 }
 0x122   :  { %534 = vst [vmem:[#allocation7] sm:$0xff] %v533_v34   ;;  %573 = vst [vmem:[#allocation7 + $0x20] sm:$0xff] %v553_v35  }
 0x123   :  { %424 = vst [vmem:[#allocation8 + $0x8] sm:$0xff] %v408_v38  ;;  %432 = vst [vmem:[#allocation8 + $0x48] sm:$0xff] %v416_v39 }
 0x125   :  { %v251_v40 = vpop.f32.mrb[4].mxu0  ;;  %v291_v41 = vpop.f32.mrb[4].mxu1 }
 0x126   :  { %v253_v42 = vpop.f32.mrb[5].mxu0  ;;  %v293_v43 = vpop.f32.mrb[5].mxu1 }
 0x127   :  { %v409_v44 = vadd.f32 %v805_v25, %v253_v42  ;;  %v417_v45 = vadd.f32 %v805_v25, %v293_v43  ;;  %v255_v46 = vpop.f32.mrb[6].mxu0  ;;  %v295_v47 = vpop.f32.mrb[6].mxu1 }
 0x128   :  { %v538_v48 = vpack.c.bf16 %v255_v46, %v251_v40  ;;  %v558_v49 = vpack.c.bf16 %v295_v47, %v291_v41  ;;  %v257_v50 = vpop.f32.mrb[7].mxu0  ;;  %v297_v51 = vpop.f32.mrb[7].mxu1 }
 0x129   :  { %425 = vst [vmem:[#allocation8 + $0x10] sm:$0xff] %v409_v44  ;;  %433 = vst [vmem:[#allocation8 + $0x50] sm:$0xff] %v417_v45  ;;  %v410_v52 = vadd.f32 %v805_v25, %v257_v50  ;;  %v418_v53 = vadd.f32 %v805_v25, %v297_v51 }
 0x12a   :  { %570 = vst [vmem:[#allocation7 + $0x8] sm:$0xff] %v538_v48   ;;  %574 = vst [vmem:[#allocation7 + $0x28] sm:$0xff] %v558_v49  }
 0x12b   :  { %426 = vst [vmem:[#allocation8 + $0x18] sm:$0xff] %v410_v52  ;;  %434 = vst [vmem:[#allocation8 + $0x58] sm:$0xff] %v418_v53 }
 0x12d   :  { %v261_v54 = vpop.f32.mrb[8].mxu0  ;;  %v301_v55 = vpop.f32.mrb[8].mxu1 }
 0x12e   :  { %v263_v56 = vpop.f32.mrb[9].mxu0  ;;  %v303_v57 = vpop.f32.mrb[9].mxu1 }
 0x12f   :  { %v411_v58 = vadd.f32 %v805_v25, %v263_v56  ;;  %v419_v59 = vadd.f32 %v805_v25, %v303_v57  ;;  %v265_v60 = vpop.f32.mrb[10].mxu0  ;;  %v305_v61 = vpop.f32.mrb[10].mxu1 }
 0x130   :  { %v543_v62 = vpack.c.bf16 %v265_v60, %v261_v54  ;;  %v563_v63 = vpack.c.bf16 %v305_v61, %v301_v55  ;;  %v267_v0 = vpop.f32.mrb[11].mxu0  ;;  %v307_v1 = vpop.f32.mrb[11].mxu1 }
 0x131   :  { %427 = vst [vmem:[#allocation8 + $0x20] sm:$0xff] %v411_v58  ;;  %435 = vst [vmem:[#allocation8 + $0x60] sm:$0xff] %v419_v59  ;;  %v412_v2 = vadd.f32 %v805_v25, %v267_v0  ;;  %v420_v3 = vadd.f32 %v805_v25, %v307_v1 }
 0x132   :  { %571 = vst [vmem:[#allocation7 + $0x10] sm:$0xff] %v543_v62   ;;  %575 = vst [vmem:[#allocation7 + $0x30] sm:$0xff] %v563_v63  }
 0x133   :  { %428 = vst [vmem:[#allocation8 + $0x28] sm:$0xff] %v412_v2  ;;  %436 = vst [vmem:[#allocation8 + $0x68] sm:$0xff] %v420_v3 }
 0x135   :  { %v271_v4 = vpop.f32.mrb[12].mxu0  ;;  %v311_v5 = vpop.f32.mrb[12].mxu1 }
 0x136   :  { %v273_v6 = vpop.f32.mrb[13].mxu0  ;;  %v313_v7 = vpop.f32.mrb[13].mxu1 }
 0x137   :  { %v413_v8 = vadd.f32 %v805_v25, %v273_v6  ;;  %v421_v9 = vadd.f32 %v805_v25, %v313_v7  ;;  %v275_v10 = vpop.f32.mrb[14].mxu0  ;;  %v315_v11 = vpop.f32.mrb[14].mxu1 }
 0x138   :  { %v548_v12 = vpack.c.bf16 %v275_v10, %v271_v4  ;;  %v568_v13 = vpack.c.bf16 %v315_v11, %v311_v5  ;;  %v277_v14 = vpop.f32.mrb[15].mxu0  ;;  %v317_v15 = vpop.f32.mrb[15].mxu1 }
 0x139   :  { %429 = vst [vmem:[#allocation8 + $0x30] sm:$0xff] %v413_v8  ;;  %437 = vst [vmem:[#allocation8 + $0x70] sm:$0xff] %v421_v9  ;;  %v414_v16 = vadd.f32 %v805_v25, %v277_v14  ;;  %v422_v17 = vadd.f32 %v805_v25, %v317_v15 }
 0x13a   :  { %572 = vst [vmem:[#allocation7 + $0x18] sm:$0xff] %v548_v12   ;;  %576 = vst [vmem:[#allocation7 + $0x38] sm:$0xff] %v568_v13  }
 0x13b   :  { %430 = vst [vmem:[#allocation8 + $0x38] sm:$0xff] %v414_v16  ;;  %438 = vst [vmem:[#allocation8 + $0x78] sm:$0xff] %v422_v17 }
 0x13c   :  { %689 = shalt.err (!%p686_p6)
}
 0x13d   :  { %s690_s23 = scalar_lea.hbm %s863_s3, 1024 }
 0x13e   :  { %p691_p7 = scmp.ne.s32.totalorder %s863_s3, %s690_s23  ;;  %p694_p8 = scmp.lt.u32.totalorder %s690_s23, %s863_s3 }
 0x140   :  { %p696_p9 = pnand %p694_p8, %p691_p7 }
 0x142   :  { %699 = shalt.err (!%p696_p9)
}
 0x143   :  { %450 = dma.vmem_to_hbm [thread:$0]  %s445_s17, 1024, %s863_s3, [#allocation4], %s731_s25, %s731_s25, %s732_s26  }
 0x144   :  { %s700_s6 = scalar_lea.vmem %s823_s19, 2048  ;;  %p705_p11 = scmp.lt.s32.totalorder %s823_s19, %s823_s19 }
 0x145   :  { %p701_p10 = scmp.ne.s32.totalorder %s823_s19, %s700_s6  ;;  %p706_p12 = scmp.lt.s32.totalorder %s700_s6, %s700_s6 }
 0x147   :  { %p707_p13 = por %p706_p12, %p705_p11 }
 0x149   :  { %p708_p0 = pnand %p707_p13, %p701_p10 }
 0x14b   :  { %711 = shalt.err (!%p708_p0)
}
 0x14c   :  { %s712_s9 = scalar_lea.hbm %s864_s4, 2048 }
 0x14d   :  { %p713_p1 = scmp.ne.s32.totalorder %s864_s4, %s712_s9  ;;  %p716_p2 = scmp.lt.u32.totalorder %s712_s9, %s864_s4 }
 0x14f   :  { %p718_p3 = pnand %p716_p2, %p713_p1 }
 0x151   :  { %721 = shalt.err (!%p718_p3)
}
 0x152   :  { %462 = dma.vmem_to_hbm [thread:$0]  %s823_s19, 2048, %s864_s4, [#allocation9], %s734_s0, %s734_s0, %s735_s13  }
 0x153   :  { %726 = dma.done.wait [#allocation4], 1024  }
 0x154   :  { %727 = vsyncadd [#allocation4], 4294966272 }
 0x155   :  { %728 = dma.done.wait [#allocation9], 2048  }
 0x156   :  { %729 = vsyncadd [#allocation9], 4294965248 }
 0x157   :  { %469 = vsyncpa [#allocation3], 1 }
 0x158   :  { %470 = vsyncpa [#allocation6], 1 }
 0x159   :  { %471 = vsyncpa [#allocation4], 1 }
 0x15a   :  { %472 = vsyncpa [#allocation9], 1 }

</bundles_post_ra>
